<compile_context>
chip_gen: v6e
topology: v6e:2x2x1
jax: 0.10.0
libtpu: 0.0.40
codegen_flags: <defaults>
</compile_context>

<pallas_src>
import jax
import jax.numpy as jnp
from jax.experimental import pallas as pl
from jax.experimental.pallas import tpu as pltpu


# ---------------------------------------------------------------------------
# Fused kernel: all dendritic stages + row softmax in one grid point.
# ---------------------------------------------------------------------------
def _make_fused_kernel(in_features, num_classes, stage_dims):
    """stage_dims = [(g, m), ...] for every stage, in execution order."""
    n_stages = len(stage_dims)

    def kernel(x_ref, *refs):
        o_ref = refs[-1]
        wb = refs[:-1]                      # w0, b0, w1, b1, ...

        # ---- stage 0: consumes tile(x, num_classes) without materializing it.
        # Contiguous-slice grouping: branch k reads cols [k*m0, (k+1)*m0) of the
        # conceptual tiled input; since m0 divides in_features that is exactly
        # x[:, (k*m0) % in_features : ... + m0]  (static, 128-lane aligned slices).
        g0, m0 = stage_dims[0]
        w0 = wb[0][...]                     # (g0, m0)
        acc = wb[1][...]                    # (1, m0) bias, broadcasts over batch
        for k in range(g0):                 # static unroll (g0 = 8)
            start = (k * m0) % in_features
            acc = acc + x_ref[:, start:start + m0] * w0[k:k + 1, :]
        z = jnp.tanh(acc)                   # (B, m0)

        # ---- remaining stages: plain contiguous lane slices of the live value z.
        for s in range(1, n_stages):
            g, m = stage_dims[s]
            w = wb[2 * s][...]              # (g, m)
            acc = wb[2 * s + 1][...]        # (1, m)
            for k in range(g):              # static unroll (g in {8, 2})
                acc = acc + z[:, k * m:(k + 1) * m] * w[k:k + 1, :]
            z = jnp.tanh(acc)               # (B, m)

        # ---- row softmax (nn.Softmax(dim=1)), numerically stable; EUP reciprocal.
        zmax = jnp.max(z, axis=-1, keepdims=True)
        e = jnp.exp(z - zmax)
        inv = pl.reciprocal(jnp.sum(e, axis=-1, keepdims=True), approx=True)
        o_ref[...] = e * inv

    return kernel


# ---------------------------------------------------------------------------
# Wrapper: one pallas_call, whole arrays as single blocks (everything fits VMEM).
# ---------------------------------------------------------------------------
def mnist_classifier_forward(x, params1, params2, num_classes):
    """x: (B, in_features); params*: list of (w (g, m), b (1, m))."""
    B, in_features = x.shape
    stages = list(params1) + list(params2)
    stage_dims = [tuple(w.shape) for w, _ in stages]

    g0, m0 = stage_dims[0]
    assert g0 * m0 == in_features * num_classes, (g0, m0, in_features, num_classes)
    assert in_features % m0 == 0, (in_features, m0)  # lets stage 0 slice x directly
    n = g0 * m0
    for g, m in stage_dims:                          # widths must chain
        assert n == g * m, (n, g, m)
        n = m

    kernel = _make_fused_kernel(in_features, num_classes, stage_dims)

    inputs = [x]
    in_specs = [pl.BlockSpec(x.shape, lambda i: (0, 0))]
    for w, b in stages:
        inputs += [w, b]
        in_specs += [pl.BlockSpec(w.shape, lambda i: (0, 0)),
                     pl.BlockSpec(b.shape, lambda i: (0, 0))]

    out_m = stage_dims[-1][1]
    return pl.pallas_call(
        kernel,
        out_shape=jax.ShapeDtypeStruct((B, out_m), jnp.float32),
        grid=(1,),
        in_specs=in_specs,
        out_specs=pl.BlockSpec((B, out_m), lambda i: (0, 0)),
        compiler_params=pltpu.CompilerParams(dimension_semantics=("arbitrary",)),
    )(*inputs)


# ---------------------------------------------------------------------------
# Parameter init (deterministic, in-script) and pure-JAX reference.
# ---------------------------------------------------------------------------
def init_dendritic_layer(key, n_in, branching, depth):
    """Returns [(w (branching, m), b (1, m)), ...] with widths n_in / branching**(i+1)."""
    params = []
    n = n_in
    for _ in range(depth):
        assert n % branching == 0, (n, branching)
        m = n // branching
        key, kw = jax.random.split(key)
        w = jax.random.normal(kw, (branching, m), jnp.float32) / jnp.sqrt(
            jnp.float32(branching))
        b = jnp.zeros((1, m), jnp.float32)
        params.append((w, b))
        n = m
    return params, key


def reference_forward(x, params1, params2, num_classes):
    """Pure-JAX reference with the same contiguous-slice grouping convention."""
    z = jnp.tile(x, (1, num_classes))
    for w, b in list(params1) + list(params2):
        g, m = w.shape
        acc = b
        for k in range(g):
            acc = acc + z[:, k * m:(k + 1) * m] * w[k:k + 1, :]
        z = jnp.tanh(acc)
    return jax.nn.softmax(z, axis=1)


# ---------------------------------------------------------------------------
# Main
# ---------------------------------------------------------------------------
if __name__ == "__main__":
    # Total tree reduction = 8**2 * 2**4 = 1024, so in_features = 1024 (32x32 MNIST)
    # with num_classes = 4 makes the network end exactly at num_classes units.
    IN_FEATURES = 1024
    NUM_CLASSES = 4
    BATCH = 8

    key = jax.random.PRNGKey(0)
    key, kx = jax.random.split(key)
    x = jax.random.normal(kx, (BATCH, IN_FEATURES), jnp.float32)

    n_rep = IN_FEATURES * NUM_CLASSES                                        # 4096
    params1, key = init_dendritic_layer(key, n_rep, branching=8, depth=2)    # 4096->512->64
    params2, key = init_dendritic_layer(key, n_rep // 8 ** 2, branching=2, depth=4)  # 64->...->4

    y = mnist_classifier_forward(x, params1, params2, NUM_CLASSES)
    y = jax.block_until_ready(y)

    assert y.shape == (BATCH, NUM_CLASSES), y.shape
    # Loose tolerances: the softmax denominator uses the approximate EUP reciprocal.
    assert bool(jnp.all(jnp.abs(jnp.sum(y, axis=1) - 1.0) < 1e-2))
    y_ref = reference_forward(x, params1, params2, NUM_CLASSES)
    assert bool(jnp.allclose(y, y_ref, atol=1e-2)), float(jnp.max(jnp.abs(y - y_ref)))
    print("KERNEL_OK")
</pallas_src>

<mosaic_0001>
module attributes {stable_mosaic.version = 11 : i64} {
  func.func @kernel(%arg0: i32, %arg1: memref<8x1024xf32, #tpu.memory_space<vmem>>, %arg2: memref<8x512xf32, #tpu.memory_space<vmem>>, %arg3: memref<1x512xf32, #tpu.memory_space<vmem>>, %arg4: memref<8x64xf32, #tpu.memory_space<vmem>>, %arg5: memref<1x64xf32, #tpu.memory_space<vmem>>, %arg6: memref<2x32xf32, #tpu.memory_space<vmem>>, %arg7: memref<1x32xf32, #tpu.memory_space<vmem>>, %arg8: memref<2x16xf32, #tpu.memory_space<vmem>>, %arg9: memref<1x16xf32, #tpu.memory_space<vmem>>, %arg10: memref<2x8xf32, #tpu.memory_space<vmem>>, %arg11: memref<1x8xf32, #tpu.memory_space<vmem>>, %arg12: memref<2x4xf32, #tpu.memory_space<vmem>>, %arg13: memref<1x4xf32, #tpu.memory_space<vmem>>, %arg14: memref<8x4xf32, #tpu.memory_space<vmem>>) attributes {dimension_semantics = [#tpu.dimension_semantics<arbitrary>], iteration_bounds = array<i64: 1>, scalar_prefetch = 0 : i64, scratch_operands = 0 : i64, tpu.core_type = #tpu.core_type<tc>, window_params = [{pipeline_mode = #tpu.pipeline_mode<synchronous>, transform_indices = @transform_0, window_bounds = array<i64: 8, 1024>}, {pipeline_mode = #tpu.pipeline_mode<synchronous>, transform_indices = @transform_1, window_bounds = array<i64: 8, 512>}, {pipeline_mode = #tpu.pipeline_mode<synchronous>, transform_indices = @transform_2, window_bounds = array<i64: 1, 512>}, {pipeline_mode = #tpu.pipeline_mode<synchronous>, transform_indices = @transform_3, window_bounds = array<i64: 8, 64>}, {pipeline_mode = #tpu.pipeline_mode<synchronous>, transform_indices = @transform_4, window_bounds = array<i64: 1, 64>}, {pipeline_mode = #tpu.pipeline_mode<synchronous>, transform_indices = @transform_5, window_bounds = array<i64: 2, 32>}, {pipeline_mode = #tpu.pipeline_mode<synchronous>, transform_indices = @transform_6, window_bounds = array<i64: 1, 32>}, {pipeline_mode = #tpu.pipeline_mode<synchronous>, transform_indices = @transform_7, window_bounds = array<i64: 2, 16>}, {pipeline_mode = #tpu.pipeline_mode<synchronous>, transform_indices = @transform_8, window_bounds = array<i64: 1, 16>}, {pipeline_mode = #tpu.pipeline_mode<synchronous>, transform_indices = @transform_9, window_bounds = array<i64: 2, 8>}, {pipeline_mode = #tpu.pipeline_mode<synchronous>, transform_indices = @transform_10, window_bounds = array<i64: 1, 8>}, {pipeline_mode = #tpu.pipeline_mode<synchronous>, transform_indices = @transform_11, window_bounds = array<i64: 2, 4>}, {pipeline_mode = #tpu.pipeline_mode<synchronous>, transform_indices = @transform_12, window_bounds = array<i64: 1, 4>}, {pipeline_mode = #tpu.pipeline_mode<synchronous>, transform_indices = @transform_13, window_bounds = array<i64: 8, 4>}]} {
    %c0 = arith.constant 0 : index
    %c0_0 = arith.constant 0 : index
    %0 = vector.load %arg2[%c0, %c0_0] : memref<8x512xf32, #tpu.memory_space<vmem>>, vector<8x512xf32>
    %c0_1 = arith.constant 0 : index
    %c0_2 = arith.constant 0 : index
    %1 = vector.load %arg3[%c0_1, %c0_2] : memref<1x512xf32, #tpu.memory_space<vmem>>, vector<1x512xf32>
    %c0_3 = arith.constant 0 : index
    %c0_4 = arith.constant 0 : index
    %2 = vector.load %arg1[%c0_3, %c0_4] : memref<8x1024xf32, #tpu.memory_space<vmem>>, vector<8x512xf32>
    %3 = vector.extract_strided_slice %0 {offsets = [0, 0], sizes = [1, 512], strides = [1, 1]} : vector<8x512xf32> to vector<1x512xf32>
    %4 = vector.broadcast %3 : vector<1x512xf32> to vector<8x512xf32>
    %5 = arith.mulf %2, %4 : vector<8x512xf32>
    %6 = vector.broadcast %1 : vector<1x512xf32> to vector<8x512xf32>
    %7 = arith.addf %6, %5 : vector<8x512xf32>
    %c0_5 = arith.constant 0 : index
    %c512 = arith.constant 512 : index
    %8 = vector.load %arg1[%c0_5, %c512] : memref<8x1024xf32, #tpu.memory_space<vmem>>, vector<8x512xf32>
    %9 = vector.extract_strided_slice %0 {offsets = [1, 0], sizes = [1, 512], strides = [1, 1]} : vector<8x512xf32> to vector<1x512xf32>
    %10 = vector.broadcast %9 : vector<1x512xf32> to vector<8x512xf32>
    %11 = arith.mulf %8, %10 : vector<8x512xf32>
    %12 = arith.addf %7, %11 : vector<8x512xf32>
    %c0_6 = arith.constant 0 : index
    %c0_7 = arith.constant 0 : index
    %13 = vector.load %arg1[%c0_6, %c0_7] : memref<8x1024xf32, #tpu.memory_space<vmem>>, vector<8x512xf32>
    %14 = vector.extract_strided_slice %0 {offsets = [2, 0], sizes = [1, 512], strides = [1, 1]} : vector<8x512xf32> to vector<1x512xf32>
    %15 = vector.broadcast %14 : vector<1x512xf32> to vector<8x512xf32>
    %16 = arith.mulf %13, %15 : vector<8x512xf32>
    %17 = arith.addf %12, %16 : vector<8x512xf32>
    %c0_8 = arith.constant 0 : index
    %c512_9 = arith.constant 512 : index
    %18 = vector.load %arg1[%c0_8, %c512_9] : memref<8x1024xf32, #tpu.memory_space<vmem>>, vector<8x512xf32>
    %19 = vector.extract_strided_slice %0 {offsets = [3, 0], sizes = [1, 512], strides = [1, 1]} : vector<8x512xf32> to vector<1x512xf32>
    %20 = vector.broadcast %19 : vector<1x512xf32> to vector<8x512xf32>
    %21 = arith.mulf %18, %20 : vector<8x512xf32>
    %22 = arith.addf %17, %21 : vector<8x512xf32>
    %c0_10 = arith.constant 0 : index
    %c0_11 = arith.constant 0 : index
    %23 = vector.load %arg1[%c0_10, %c0_11] : memref<8x1024xf32, #tpu.memory_space<vmem>>, vector<8x512xf32>
    %24 = vector.extract_strided_slice %0 {offsets = [4, 0], sizes = [1, 512], strides = [1, 1]} : vector<8x512xf32> to vector<1x512xf32>
    %25 = vector.broadcast %24 : vector<1x512xf32> to vector<8x512xf32>
    %26 = arith.mulf %23, %25 : vector<8x512xf32>
    %27 = arith.addf %22, %26 : vector<8x512xf32>
    %c0_12 = arith.constant 0 : index
    %c512_13 = arith.constant 512 : index
    %28 = vector.load %arg1[%c0_12, %c512_13] : memref<8x1024xf32, #tpu.memory_space<vmem>>, vector<8x512xf32>
    %29 = vector.extract_strided_slice %0 {offsets = [5, 0], sizes = [1, 512], strides = [1, 1]} : vector<8x512xf32> to vector<1x512xf32>
    %30 = vector.broadcast %29 : vector<1x512xf32> to vector<8x512xf32>
    %31 = arith.mulf %28, %30 : vector<8x512xf32>
    %32 = arith.addf %27, %31 : vector<8x512xf32>
    %c0_14 = arith.constant 0 : index
    %c0_15 = arith.constant 0 : index
    %33 = vector.load %arg1[%c0_14, %c0_15] : memref<8x1024xf32, #tpu.memory_space<vmem>>, vector<8x512xf32>
    %34 = vector.extract_strided_slice %0 {offsets = [6, 0], sizes = [1, 512], strides = [1, 1]} : vector<8x512xf32> to vector<1x512xf32>
    %35 = vector.broadcast %34 : vector<1x512xf32> to vector<8x512xf32>
    %36 = arith.mulf %33, %35 : vector<8x512xf32>
    %37 = arith.addf %32, %36 : vector<8x512xf32>
    %c0_16 = arith.constant 0 : index
    %c512_17 = arith.constant 512 : index
    %38 = vector.load %arg1[%c0_16, %c512_17] : memref<8x1024xf32, #tpu.memory_space<vmem>>, vector<8x512xf32>
    %39 = vector.extract_strided_slice %0 {offsets = [7, 0], sizes = [1, 512], strides = [1, 1]} : vector<8x512xf32> to vector<1x512xf32>
    %40 = vector.broadcast %39 : vector<1x512xf32> to vector<8x512xf32>
    %41 = arith.mulf %38, %40 : vector<8x512xf32>
    %42 = arith.addf %37, %41 : vector<8x512xf32>
    %43 = math.tanh %42 : vector<8x512xf32>
    %c0_18 = arith.constant 0 : index
    %c0_19 = arith.constant 0 : index
    %44 = vector.load %arg4[%c0_18, %c0_19] : memref<8x64xf32, #tpu.memory_space<vmem>>, vector<8x64xf32>
    %c0_20 = arith.constant 0 : index
    %c0_21 = arith.constant 0 : index
    %45 = vector.load %arg5[%c0_20, %c0_21] : memref<1x64xf32, #tpu.memory_space<vmem>>, vector<1x64xf32>
    %46 = vector.extract_strided_slice %43 {offsets = [0, 0], sizes = [8, 64], strides = [1, 1]} : vector<8x512xf32> to vector<8x64xf32>
    %47 = vector.extract_strided_slice %44 {offsets = [0, 0], sizes = [1, 64], strides = [1, 1]} : vector<8x64xf32> to vector<1x64xf32>
    %48 = vector.broadcast %47 : vector<1x64xf32> to vector<8x64xf32>
    %49 = arith.mulf %46, %48 : vector<8x64xf32>
    %50 = vector.broadcast %45 : vector<1x64xf32> to vector<8x64xf32>
    %51 = arith.addf %50, %49 : vector<8x64xf32>
    %52 = vector.extract_strided_slice %43 {offsets = [0, 64], sizes = [8, 64], strides = [1, 1]} : vector<8x512xf32> to vector<8x64xf32>
    %53 = vector.extract_strided_slice %44 {offsets = [1, 0], sizes = [1, 64], strides = [1, 1]} : vector<8x64xf32> to vector<1x64xf32>
    %54 = vector.broadcast %53 : vector<1x64xf32> to vector<8x64xf32>
    %55 = arith.mulf %52, %54 : vector<8x64xf32>
    %56 = arith.addf %51, %55 : vector<8x64xf32>
    %57 = vector.extract_strided_slice %43 {offsets = [0, 128], sizes = [8, 64], strides = [1, 1]} : vector<8x512xf32> to vector<8x64xf32>
    %58 = vector.extract_strided_slice %44 {offsets = [2, 0], sizes = [1, 64], strides = [1, 1]} : vector<8x64xf32> to vector<1x64xf32>
    %59 = vector.broadcast %58 : vector<1x64xf32> to vector<8x64xf32>
    %60 = arith.mulf %57, %59 : vector<8x64xf32>
    %61 = arith.addf %56, %60 : vector<8x64xf32>
    %62 = vector.extract_strided_slice %43 {offsets = [0, 192], sizes = [8, 64], strides = [1, 1]} : vector<8x512xf32> to vector<8x64xf32>
    %63 = vector.extract_strided_slice %44 {offsets = [3, 0], sizes = [1, 64], strides = [1, 1]} : vector<8x64xf32> to vector<1x64xf32>
    %64 = vector.broadcast %63 : vector<1x64xf32> to vector<8x64xf32>
    %65 = arith.mulf %62, %64 : vector<8x64xf32>
    %66 = arith.addf %61, %65 : vector<8x64xf32>
    %67 = vector.extract_strided_slice %43 {offsets = [0, 256], sizes = [8, 64], strides = [1, 1]} : vector<8x512xf32> to vector<8x64xf32>
    %68 = vector.extract_strided_slice %44 {offsets = [4, 0], sizes = [1, 64], strides = [1, 1]} : vector<8x64xf32> to vector<1x64xf32>
    %69 = vector.broadcast %68 : vector<1x64xf32> to vector<8x64xf32>
    %70 = arith.mulf %67, %69 : vector<8x64xf32>
    %71 = arith.addf %66, %70 : vector<8x64xf32>
    %72 = vector.extract_strided_slice %43 {offsets = [0, 320], sizes = [8, 64], strides = [1, 1]} : vector<8x512xf32> to vector<8x64xf32>
    %73 = vector.extract_strided_slice %44 {offsets = [5, 0], sizes = [1, 64], strides = [1, 1]} : vector<8x64xf32> to vector<1x64xf32>
    %74 = vector.broadcast %73 : vector<1x64xf32> to vector<8x64xf32>
    %75 = arith.mulf %72, %74 : vector<8x64xf32>
    %76 = arith.addf %71, %75 : vector<8x64xf32>
    %77 = vector.extract_strided_slice %43 {offsets = [0, 384], sizes = [8, 64], strides = [1, 1]} : vector<8x512xf32> to vector<8x64xf32>
    %78 = vector.extract_strided_slice %44 {offsets = [6, 0], sizes = [1, 64], strides = [1, 1]} : vector<8x64xf32> to vector<1x64xf32>
    %79 = vector.broadcast %78 : vector<1x64xf32> to vector<8x64xf32>
    %80 = arith.mulf %77, %79 : vector<8x64xf32>
    %81 = arith.addf %76, %80 : vector<8x64xf32>
    %82 = vector.extract_strided_slice %43 {offsets = [0, 448], sizes = [8, 64], strides = [1, 1]} : vector<8x512xf32> to vector<8x64xf32>
    %83 = vector.extract_strided_slice %44 {offsets = [7, 0], sizes = [1, 64], strides = [1, 1]} : vector<8x64xf32> to vector<1x64xf32>
    %84 = vector.broadcast %83 : vector<1x64xf32> to vector<8x64xf32>
    %85 = arith.mulf %82, %84 : vector<8x64xf32>
    %86 = arith.addf %81, %85 : vector<8x64xf32>
    %87 = math.tanh %86 : vector<8x64xf32>
    %c0_22 = arith.constant 0 : index
    %c0_23 = arith.constant 0 : index
    %88 = vector.load %arg6[%c0_22, %c0_23] : memref<2x32xf32, #tpu.memory_space<vmem>>, vector<2x32xf32>
    %c0_24 = arith.constant 0 : index
    %c0_25 = arith.constant 0 : index
    %89 = vector.load %arg7[%c0_24, %c0_25] : memref<1x32xf32, #tpu.memory_space<vmem>>, vector<1x32xf32>
    %90 = vector.extract_strided_slice %87 {offsets = [0, 0], sizes = [8, 32], strides = [1, 1]} : vector<8x64xf32> to vector<8x32xf32>
    %91 = vector.extract_strided_slice %88 {offsets = [0, 0], sizes = [1, 32], strides = [1, 1]} : vector<2x32xf32> to vector<1x32xf32>
    %92 = vector.broadcast %91 : vector<1x32xf32> to vector<8x32xf32>
    %93 = arith.mulf %90, %92 : vector<8x32xf32>
    %94 = vector.broadcast %89 : vector<1x32xf32> to vector<8x32xf32>
    %95 = arith.addf %94, %93 : vector<8x32xf32>
    %96 = vector.extract_strided_slice %87 {offsets = [0, 32], sizes = [8, 32], strides = [1, 1]} : vector<8x64xf32> to vector<8x32xf32>
    %97 = vector.extract_strided_slice %88 {offsets = [1, 0], sizes = [1, 32], strides = [1, 1]} : vector<2x32xf32> to vector<1x32xf32>
    %98 = vector.broadcast %97 : vector<1x32xf32> to vector<8x32xf32>
    %99 = arith.mulf %96, %98 : vector<8x32xf32>
    %100 = arith.addf %95, %99 : vector<8x32xf32>
    %101 = math.tanh %100 : vector<8x32xf32>
    %c0_26 = arith.constant 0 : index
    %c0_27 = arith.constant 0 : index
    %102 = vector.load %arg8[%c0_26, %c0_27] : memref<2x16xf32, #tpu.memory_space<vmem>>, vector<2x16xf32>
    %c0_28 = arith.constant 0 : index
    %c0_29 = arith.constant 0 : index
    %103 = vector.load %arg9[%c0_28, %c0_29] : memref<1x16xf32, #tpu.memory_space<vmem>>, vector<1x16xf32>
    %104 = vector.extract_strided_slice %101 {offsets = [0, 0], sizes = [8, 16], strides = [1, 1]} : vector<8x32xf32> to vector<8x16xf32>
    %105 = vector.extract_strided_slice %102 {offsets = [0, 0], sizes = [1, 16], strides = [1, 1]} : vector<2x16xf32> to vector<1x16xf32>
    %106 = vector.broadcast %105 : vector<1x16xf32> to vector<8x16xf32>
    %107 = arith.mulf %104, %106 : vector<8x16xf32>
    %108 = vector.broadcast %103 : vector<1x16xf32> to vector<8x16xf32>
    %109 = arith.addf %108, %107 : vector<8x16xf32>
    %110 = vector.extract_strided_slice %101 {offsets = [0, 16], sizes = [8, 16], strides = [1, 1]} : vector<8x32xf32> to vector<8x16xf32>
    %111 = vector.extract_strided_slice %102 {offsets = [1, 0], sizes = [1, 16], strides = [1, 1]} : vector<2x16xf32> to vector<1x16xf32>
    %112 = vector.broadcast %111 : vector<1x16xf32> to vector<8x16xf32>
    %113 = arith.mulf %110, %112 : vector<8x16xf32>
    %114 = arith.addf %109, %113 : vector<8x16xf32>
    %115 = math.tanh %114 : vector<8x16xf32>
    %c0_30 = arith.constant 0 : index
    %c0_31 = arith.constant 0 : index
    %116 = vector.load %arg10[%c0_30, %c0_31] : memref<2x8xf32, #tpu.memory_space<vmem>>, vector<2x8xf32>
    %c0_32 = arith.constant 0 : index
    %c0_33 = arith.constant 0 : index
    %117 = vector.load %arg11[%c0_32, %c0_33] : memref<1x8xf32, #tpu.memory_space<vmem>>, vector<1x8xf32>
    %118 = vector.extract_strided_slice %115 {offsets = [0, 0], sizes = [8, 8], strides = [1, 1]} : vector<8x16xf32> to vector<8x8xf32>
    %119 = vector.extract_strided_slice %116 {offsets = [0, 0], sizes = [1, 8], strides = [1, 1]} : vector<2x8xf32> to vector<1x8xf32>
    %120 = vector.broadcast %119 : vector<1x8xf32> to vector<8x8xf32>
    %121 = arith.mulf %118, %120 : vector<8x8xf32>
    %122 = vector.broadcast %117 : vector<1x8xf32> to vector<8x8xf32>
    %123 = arith.addf %122, %121 : vector<8x8xf32>
    %124 = vector.extract_strided_slice %115 {offsets = [0, 8], sizes = [8, 8], strides = [1, 1]} : vector<8x16xf32> to vector<8x8xf32>
    %125 = vector.extract_strided_slice %116 {offsets = [1, 0], sizes = [1, 8], strides = [1, 1]} : vector<2x8xf32> to vector<1x8xf32>
    %126 = vector.broadcast %125 : vector<1x8xf32> to vector<8x8xf32>
    %127 = arith.mulf %124, %126 : vector<8x8xf32>
    %128 = arith.addf %123, %127 : vector<8x8xf32>
    %129 = math.tanh %128 : vector<8x8xf32>
    %c0_34 = arith.constant 0 : index
    %c0_35 = arith.constant 0 : index
    %130 = vector.load %arg12[%c0_34, %c0_35] : memref<2x4xf32, #tpu.memory_space<vmem>>, vector<2x4xf32>
    %c0_36 = arith.constant 0 : index
    %c0_37 = arith.constant 0 : index
    %131 = vector.load %arg13[%c0_36, %c0_37] : memref<1x4xf32, #tpu.memory_space<vmem>>, vector<1x4xf32>
    %132 = vector.extract_strided_slice %129 {offsets = [0, 0], sizes = [8, 4], strides = [1, 1]} : vector<8x8xf32> to vector<8x4xf32>
    %133 = vector.extract_strided_slice %130 {offsets = [0, 0], sizes = [1, 4], strides = [1, 1]} : vector<2x4xf32> to vector<1x4xf32>
    %134 = vector.broadcast %133 : vector<1x4xf32> to vector<8x4xf32>
    %135 = arith.mulf %132, %134 : vector<8x4xf32>
    %136 = vector.broadcast %131 : vector<1x4xf32> to vector<8x4xf32>
    %137 = arith.addf %136, %135 : vector<8x4xf32>
    %138 = vector.extract_strided_slice %129 {offsets = [0, 4], sizes = [8, 4], strides = [1, 1]} : vector<8x8xf32> to vector<8x4xf32>
    %139 = vector.extract_strided_slice %130 {offsets = [1, 0], sizes = [1, 4], strides = [1, 1]} : vector<2x4xf32> to vector<1x4xf32>
    %140 = vector.broadcast %139 : vector<1x4xf32> to vector<8x4xf32>
    %141 = arith.mulf %138, %140 : vector<8x4xf32>
    %142 = arith.addf %137, %141 : vector<8x4xf32>
    %143 = math.tanh %142 : vector<8x4xf32>
    %cst = arith.constant dense<0xFF800000> : vector<8xf32>
    %144 = vector.multi_reduction <maximumf>, %143, %cst [1] : vector<8x4xf32> to vector<8xf32>
    %145 = vector.shape_cast %144 : vector<8xf32> to vector<8x1xf32>
    %146 = vector.broadcast %145 : vector<8x1xf32> to vector<8x4xf32>
    %147 = arith.subf %143, %146 : vector<8x4xf32>
    %148 = math.exp %147 : vector<8x4xf32>
    %cst_38 = arith.constant dense<0.000000e+00> : vector<8xf32>
    %149 = vector.multi_reduction <add>, %148, %cst_38 [1] : vector<8x4xf32> to vector<8xf32>
    %150 = vector.shape_cast %149 : vector<8xf32> to vector<8x1xf32>
    %151 = tpu.reciprocal %150 {approx = true} : vector<8x1xf32> -> vector<8x1xf32>
    %152 = vector.broadcast %151 : vector<8x1xf32> to vector<8x4xf32>
    %153 = arith.mulf %148, %152 : vector<8x4xf32>
    %c0_39 = arith.constant 0 : index
    %c0_40 = arith.constant 0 : index
    %154 = vector.load %arg14[%c0_39, %c0_40] : memref<8x4xf32, #tpu.memory_space<vmem>>, vector<8x4xf32>
    tpu.vector_store %arg14[%c0_39, %c0_40], %153 {strides = array<i32>} : memref<8x4xf32, #tpu.memory_space<vmem>>, vector<8x4xf32>,
    return
  }
  func.func @transform_0(%arg0: i32) -> (i32, i32) {
    %c0_i32 = arith.constant 0 : i32
    %c0_i32_0 = arith.constant 0 : i32
    %c0_i32_1 = arith.constant 0 : i32
    return %c0_i32, %c0_i32_0 : i32, i32
  }
  func.func @transform_1(%arg0: i32) -> (i32, i32) {
    %c0_i32 = arith.constant 0 : i32
    %c0_i32_0 = arith.constant 0 : i32
    %c0_i32_1 = arith.constant 0 : i32
    return %c0_i32, %c0_i32_0 : i32, i32
  }
  func.func @transform_2(%arg0: i32) -> (i32, i32) {
    %c0_i32 = arith.constant 0 : i32
    %c0_i32_0 = arith.constant 0 : i32
    %c0_i32_1 = arith.constant 0 : i32
    return %c0_i32, %c0_i32_0 : i32, i32
  }
  func.func @transform_3(%arg0: i32) -> (i32, i32) {
    %c0_i32 = arith.constant 0 : i32
    %c0_i32_0 = arith.constant 0 : i32
    %c0_i32_1 = arith.constant 0 : i32
    return %c0_i32, %c0_i32_0 : i32, i32
  }
  func.func @transform_4(%arg0: i32) -> (i32, i32) {
    %c0_i32 = arith.constant 0 : i32
    %c0_i32_0 = arith.constant 0 : i32
    %c0_i32_1 = arith.constant 0 : i32
    return %c0_i32, %c0_i32_0 : i32, i32
  }
  func.func @transform_5(%arg0: i32) -> (i32, i32) {
    %c0_i32 = arith.constant 0 : i32
    %c0_i32_0 = arith.constant 0 : i32
    %c0_i32_1 = arith.constant 0 : i32
    return %c0_i32, %c0_i32_0 : i32, i32
  }
  func.func @transform_6(%arg0: i32) -> (i32, i32) {
    %c0_i32 = arith.constant 0 : i32
    %c0_i32_0 = arith.constant 0 : i32
    %c0_i32_1 = arith.constant 0 : i32
    return %c0_i32, %c0_i32_0 : i32, i32
  }
  func.func @transform_7(%arg0: i32) -> (i32, i32) {
    %c0_i32 = arith.constant 0 : i32
    %c0_i32_0 = arith.constant 0 : i32
    %c0_i32_1 = arith.constant 0 : i32
    return %c0_i32, %c0_i32_0 : i32, i32
  }
  func.func @transform_8(%arg0: i32) -> (i32, i32) {
    %c0_i32 = arith.constant 0 : i32
    %c0_i32_0 = arith.constant 0 : i32
    %c0_i32_1 = arith.constant 0 : i32
    return %c0_i32, %c0_i32_0 : i32, i32
  }
  func.func @transform_9(%arg0: i32) -> (i32, i32) {
    %c0_i32 = arith.constant 0 : i32
    %c0_i32_0 = arith.constant 0 : i32
    %c0_i32_1 = arith.constant 0 : i32
    return %c0_i32, %c0_i32_0 : i32, i32
  }
  func.func @transform_10(%arg0: i32) -> (i32, i32) {
    %c0_i32 = arith.constant 0 : i32
    %c0_i32_0 = arith.constant 0 : i32
    %c0_i32_1 = arith.constant 0 : i32
    return %c0_i32, %c0_i32_0 : i32, i32
  }
  func.func @transform_11(%arg0: i32) -> (i32, i32) {
    %c0_i32 = arith.constant 0 : i32
    %c0_i32_0 = arith.constant 0 : i32
    %c0_i32_1 = arith.constant 0 : i32
    return %c0_i32, %c0_i32_0 : i32, i32
  }
  func.func @transform_12(%arg0: i32) -> (i32, i32) {
    %c0_i32 = arith.constant 0 : i32
    %c0_i32_0 = arith.constant 0 : i32
    %c0_i32_1 = arith.constant 0 : i32
    return %c0_i32, %c0_i32_0 : i32, i32
  }
  func.func @transform_13(%arg0: i32) -> (i32, i32) {
    %c0_i32 = arith.constant 0 : i32
    %c0_i32_0 = arith.constant 0 : i32
    %c0_i32_1 = arith.constant 0 : i32
    return %c0_i32, %c0_i32_0 : i32, i32
  }
}

</mosaic_0001>

<bundles_post_ra>
// kernel: tpu_custom_call.1
= control target key start
LH: loop header
LB: loop body
LE: loop exit
PB: predicated region body
PF: predicated region fallthrough
CT: control target
= control target key end

     0   :  { %18 = vsyncpa [#allocation3], 0  ;;  %s899_s0 = inlined_call_operand.hbm [shape: f32[8,1024], index: 0, kind: input, shape index: {}]   ;;  %s900_s1 = inlined_call_operand.hbm [shape: f32[8,512], index: 1, kind: input, shape index: {}]   ;;  %s901_s2 = inlined_call_operand.hbm [shape: f32[1,512], index: 2, kind: input, shape index: {}]   ;;  %s902_s3 = inlined_call_operand.hbm [shape: f32[8,64], index: 3, kind: input, shape index: {}]   ;;  %s903_s4 = inlined_call_operand.vmem [shape: f32[1,64], index: 4, kind: input, shape index: {}]   ;;  %s904_s5 = inlined_call_operand.vmem [shape: f32[2,32], index: 5, kind: input, shape index: {}]   ;;  %s905_s6 = inlined_call_operand.vmem [shape: f32[1,32], index: 6, kind: input, shape index: {}]   ;;  %s906_s7 = inlined_call_operand.vmem [shape: f32[2,16], index: 7, kind: input, shape index: {}]   ;;  %s907_s8 = inlined_call_operand.vmem [shape: f32[1,16], index: 8, kind: input, shape index: {}]   ;;  %s908_s9 = inlined_call_operand.vmem [shape: f32[2,8], index: 9, kind: input, shape index: {}]   ;;  %s909_s10 = inlined_call_operand.vmem [shape: f32[1,8], index: 10, kind: input, shape index: {}]   ;;  %s910_s11 = inlined_call_operand.vmem [shape: f32[2,4], index: 11, kind: input, shape index: {}]   ;;  %s911_s12 = inlined_call_operand.vmem [shape: f32[1,4], index: 12, kind: input, shape index: {}]   ;;  %s912_s13 = inlined_call_operand.vmem [shape: f32[8,4], index: 13, kind: output, shape index: {}]  }
   0x1   :  { %19 = vsyncpa [#allocation5], 0 }
   0x2   :  { %20 = vsyncpa [#allocation8], 0  ;;  %s672_s25 = smov [#allocation4]   ;;  %s673_s27 = smov [#allocation2]  }
   0x3   :  { %s37_s26 = sshll.u32 %s672_s25, 4  ;;  %s27_s28 = sshll.u32 %s673_s27, 4  ;;  %s38_s26 = int_to_ptr.vmem [resolvable:$true] %s37_s26  ;;  %s28_s28 = int_to_ptr.vmem [resolvable:$true] %s27_s28 }
   0x4   :  { %s594_s29 = scalar_lea.vmem %s38_s26, 512  ;;  %p599_p1 = scmp.lt.s32.totalorder %s38_s26, %s38_s26 }
   0x5   :  { %p595_p0 = scmp.ne.s32.totalorder %s38_s26, %s594_s29  ;;  %p600_p2 = scmp.lt.s32.totalorder %s594_s29, %s594_s29 }
   0x7   :  { %p601_p3 = por %p600_p2, %p599_p1 }
   0x9   :  { %p602_p4 = pnand %p601_p3, %p595_p0 }
   0xb   :  { %605 = shalt.err (!%p602_p4)
}
   0xc   :  { %40 = dma.hbm_to_vmem [thread:$0]  %s900_s1, 512, %s38_s26, [#allocation5]  }
   0xd   :  { %s614_s15 = scalar_lea.vmem %s28_s28, 1024  ;;  %p619_p6 = scmp.lt.s32.totalorder %s28_s28, %s28_s28 }
   0xe   :  { %p615_p5 = scmp.ne.s32.totalorder %s28_s28, %s614_s15  ;;  %p620_p7 = scmp.lt.s32.totalorder %s614_s15, %s614_s15 }
  0x10   :  { %p621_p8 = por %p620_p7, %p619_p6 }
  0x12   :  { %p622_p9 = pnand %p621_p8, %p615_p5 }
  0x14   :  { %625 = shalt.err (!%p622_p9)
}
  0x15   :  { %30 = dma.hbm_to_vmem [thread:$0]  %s899_s0, 1024, %s28_s28, [#allocation3]  }
  0x16   :  { %s674_s18 = smov [#allocation6]   ;;  %s675_s20 = smov [#allocation7]  }
  0x17   :  { %s47_s19 = sshll.u32 %s674_s18, 4  ;;  %s57_s21 = sshll.u32 %s675_s20, 4  ;;  %s48_s19 = int_to_ptr.vmem [resolvable:$true] %s47_s19  ;;  %s58_s21 = int_to_ptr.vmem [resolvable:$true] %s57_s21 }
  0x18   :  { %s634_s22 = scalar_lea.vmem %s48_s19, 64  ;;  %p639_p11 = scmp.lt.s32.totalorder %s48_s19, %s48_s19 }
  0x19   :  { %p635_p10 = scmp.ne.s32.totalorder %s48_s19, %s634_s22  ;;  %p640_p12 = scmp.lt.s32.totalorder %s634_s22, %s634_s22 }
  0x1b   :  { %p641_p13 = por %p640_p12, %p639_p11 }
  0x1d   :  { %p642_p0 = pnand %p641_p13, %p635_p10 }
  0x1f   :  { %645 = shalt.err (!%p642_p0)
}
  0x20   :  { %50 = dma.hbm_to_vmem [thread:$0]  %s901_s2, 64, %s48_s19, [#allocation5]  }
  0x21   :  { %s654_s24 = scalar_lea.vmem %s58_s21, 128  ;;  %p659_p2 = scmp.lt.s32.totalorder %s58_s21, %s58_s21 }
  0x22   :  { %p655_p1 = scmp.ne.s32.totalorder %s58_s21, %s654_s24  ;;  %p660_p3 = scmp.lt.s32.totalorder %s654_s24, %s654_s24 }
  0x24   :  { %p661_p4 = por %p660_p3, %p659_p2 }
  0x26   :  { %p662_p5 = pnand %p661_p4, %p655_p1 }
  0x28   :  { %665 = shalt.err (!%p662_p5)
}
  0x29   :  { %60 = dma.hbm_to_vmem [thread:$0]  %s902_s3, 128, %s58_s21, [#allocation8]  }
  0x2a   :  { %666 = dma.done.wait [#allocation3], 1024  }
  0x2b   :  { %667 = vsyncadd [#allocation3], 4294966272 }
  0x2c   :  { %668 = dma.done.wait [#allocation5], 576  }
  0x2d   :  { %669 = vsyncadd [#allocation5], 4294966720 }
  0x2e   :  { %670 = dma.done.wait [#allocation8], 128  }
  0x2f   :  { %671 = vsyncadd [#allocation8], 4294967168  ;;  %v100_v0 = vlaneseq  ;;  %v781_v9 = vld [vmem:[#allocation7] sm:$0xff]  ;;  %v785_v12 = vld [vmem:[#allocation6] sm:$0xf]  ;;  %s676_s2 = smov 64  }
  0x30   :  { %v91_v11 = vld [vmem:[#allocation4] sm:$0xff]  ;;  %v92_v26 = vld [vmem:[#allocation4 + $0x8] sm:$0xff]  ;;  %v816_v46 = vld [vmem:[#allocation4 + $0x10] sm:$0xff]  ;;  %s677_s27 = smov 32   ;;  %s678_s30 = smov 16   ;;  %vm526_vm0 = vcmask 31744  }
  0x31   :  { %v101_v1 = vshrl.u32 %v100_v0, 7  ;;  %v96_v17 = vld [vmem:[#allocation2] sm:$0xff]  ;;  %v97_v33 = vld [vmem:[#allocation2 + $0x8] sm:$0xff]  ;;  %v98_v55 = vld [vmem:[#allocation2 + $0x10] sm:$0xff]  ;;  %s680_s16 = smov 8   ;;  %s681_s19 = smov 112  }
  0x32   :  { %v145_v18 = vld [vmem:[#allocation2 + $0x20] sm:$0xff]  ;;  %v146_v38 = vld [vmem:[#allocation2 + $0x28] sm:$0xff]  ;;  %v147_v60 = vld [vmem:[#allocation2 + $0x30] sm:$0xff]  ;;  %s682_s21 = smov 4   ;;  %s683_s1 = smov 120  }
  0x33   :  { %v767_v2 = vsub.s32 1, %v101_v1  ;;  %v769_v3 = vsub.s32 3, %v101_v1  ;;  %v771_v4 = vsub.s32 5, %v101_v1  ;;  %v773_v5 = vsub.s32 7, %v101_v1 }
  0x34   :  { %v775_v6 = vsub.s32 0, %v101_v1  ;;  %v777_v7 = vsub.s32 2, %v101_v1  ;;  %v779_v8 = vsub.s32 4, %v101_v1  ;;  %v783_v10 = vsub.s32 6, %v101_v1 }
  0x35   :  { %v338_v13 = vrot.slane %v781_v9, %v767_v2  ;;  %v358_v14 = vrot.slane %v781_v9, %v769_v3  ;;  %v378_v15 = vrot.slane %v781_v9, %v771_v4  ;;  %v398_v16 = vrot.slane %v781_v9, %v773_v5 }
  0x36   :  { %v103_v19 = vrot.slane %v91_v11, %v775_v6  ;;  %v124_v20 = vrot.slane %v785_v12, %v775_v6  ;;  %v152_v21 = vrot.slane %v91_v11, %v767_v2  ;;  %v176_v22 = vrot.slane %v91_v11, %v777_v7 }
  0x37   :  { %340 = vrot.lane.b32.xlu0 %v338_v13, %s676_s2  ;;  %380 = vrot.lane.b32.xlu1 %v378_v15, %s676_s2  ;;  %v200_v23 = vrot.slane %v91_v11, %v769_v3  ;;  %v224_v24 = vrot.slane %v91_v11, %v779_v8  ;;  %v248_v25 = vrot.slane %v91_v11, %v771_v4 }
  0x38   :  { %v116_v27 = vmul.f32 %v103_v19, %v96_v17  ;;  %v165_v28 = vmul.f32 %v152_v21, %v145_v18  ;;  %v189_v29 = vmul.f32 %v176_v22, %v96_v17  ;;  %v272_v31 = vrot.slane %v91_v11, %v783_v10  ;;  %v94_v19 = vld [vmem:[#allocation4 + $0x18] sm:$0xff] }
  0x39   :  { %v213_v30 = vmul.f32 %v200_v23, %v145_v18  ;;  %v296_v32 = vrot.slane %v91_v11, %v773_v5  ;;  %v237_v35 = vmul.f32 %v224_v24, %v96_v17  ;;  %v107_v36 = vrot.slane %v92_v26, %v775_v6 }
  0x3a   :  { %v141_v34 = vadd.f32 %v124_v20, %v116_v27  ;;  %v128_v37 = vrot.slane %v785_v12, %v767_v2  ;;  %v261_v39 = vmul.f32 %v248_v25, %v145_v18  ;;  %v156_v40 = vrot.slane %v92_v26, %v767_v2 }
  0x3b   :  { %360 = vrot.lane.b32.xlu0 %v358_v14, %s676_s2  ;;  %400 = vrot.lane.b32.xlu1 %v398_v16, %s676_s2  ;;  %v180_v41 = vrot.slane %v92_v26, %v777_v7  ;;  %v117_v43 = vmul.f32 %v107_v36, %v97_v33  ;;  %v204_v44 = vrot.slane %v92_v26, %v769_v3 }
  0x3c   :  { %v169_v42 = vadd.f32 %v165_v28, %v141_v34  ;;  %v228_v45 = vrot.slane %v92_v26, %v779_v8  ;;  %v285_v47 = vmul.f32 %v272_v31, %v96_v17  ;;  %v309_v48 = vmul.f32 %v296_v32, %v145_v18  ;;  %v99_v28 = vld [vmem:[#allocation2 + $0x18] sm:$0xff] }
  0x3d   :  { %v166_v49 = vmul.f32 %v156_v40, %v146_v38  ;;  %v252_v50 = vrot.slane %v92_v26, %v771_v4  ;;  %v142_v52 = vadd.f32 %v128_v37, %v117_v43  ;;  %v190_v53 = vmul.f32 %v180_v41, %v97_v33  ;;  %v148_v37 = vld [vmem:[#allocation2 + $0x38] sm:$0xff] }
  0x3e   :  { %v193_v51 = vadd.f32 %v189_v29, %v169_v42  ;;  %v276_v54 = vrot.slane %v92_v26, %v783_v10  ;;  %v214_v56 = vmul.f32 %v204_v44, %v146_v38  ;;  %v238_v57 = vmul.f32 %v228_v45, %v97_v33 }
  0x3f   :  { %v300_v58 = vrot.slane %v92_v26, %v773_v5  ;;  %v111_v59 = vrot.slane %v816_v46, %v775_v6  ;;  %v170_v62 = vadd.f32 %v166_v49, %v142_v52  ;;  %v132_v63 = vrot.slane %v785_v12, %v777_v7 }
  0x40   :  { %v217_v61 = vadd.f32 %v213_v30, %v193_v51  ;;  %v160_v0 = vrot.slane %v816_v46, %v767_v2  ;;  %v262_v1 = vmul.f32 %v252_v50, %v146_v38  ;;  %v184_v13 = vrot.slane %v816_v46, %v777_v7 }
  0x41   :  { %v118_v11 = vmul.f32 %v111_v59, %v98_v55  ;;  %v208_v14 = vrot.slane %v816_v46, %v769_v3  ;;  %v194_v16 = vadd.f32 %v190_v53, %v170_v62  ;;  %v232_v18 = vrot.slane %v816_v46, %v779_v8 }
  0x42   :  { %v241_v15 = vadd.f32 %v237_v35, %v217_v61  ;;  %v167_v17 = vmul.f32 %v160_v0, %v147_v60  ;;  %v286_v20 = vmul.f32 %v276_v54, %v97_v33  ;;  %v191_v22 = vmul.f32 %v184_v13, %v98_v55 }
  0x43   :  { %v143_v21 = vadd.f32 %v132_v63, %v118_v11  ;;  %v256_v23 = vrot.slane %v816_v46, %v771_v4  ;;  %v218_v25 = vadd.f32 %v214_v56, %v194_v16  ;;  %v310_v26 = vmul.f32 %v300_v58, %v146_v38 }
  0x44   :  { %v265_v24 = vadd.f32 %v261_v39, %v241_v15  ;;  %v215_v27 = vmul.f32 %v208_v14, %v147_v60  ;;  %v239_v30 = vmul.f32 %v232_v18, %v98_v55  ;;  %v280_v31 = vrot.slane %v816_v46, %v783_v10 }
  0x45   :  { %v171_v29 = vadd.f32 %v167_v17, %v143_v21  ;;  %v115_v32 = vrot.slane %v94_v19, %v775_v6  ;;  %v242_v35 = vadd.f32 %v238_v57, %v218_v25  ;;  %v263_v33 = vmul.f32 %v256_v23, %v147_v60 }
  0x46   :  { %v289_v34 = vadd.f32 %v285_v47, %v265_v24  ;;  %v136_v36 = vrot.slane %v785_v12, %v769_v3  ;;  %v304_v38 = vrot.slane %v816_v46, %v773_v5  ;;  %v164_v41 = vrot.slane %v94_v19, %v767_v2 }
  0x47   :  { %v195_v40 = vadd.f32 %v191_v22, %v171_v29  ;;  %v119_v39 = vmul.f32 %v115_v32, %v99_v28  ;;  %v266_v43 = vadd.f32 %v262_v1, %v242_v35  ;;  %v188_v44 = vrot.slane %v94_v19, %v777_v7  ;;  %v546_v35 = vld [vmem:[%s903_s4] ss:$0 sm:$0xff]  ;;  %s679_s4 = smov 96  }
  0x48   :  { %v313_v42 = vadd.f32 %v309_v48, %v289_v34  ;;  %v212_v45 = vrot.slane %v94_v19, %v769_v3  ;;  %v168_v50 = vmul.f32 %v164_v41, %v148_v37  ;;  %v236_v51 = vrot.slane %v94_v19, %v779_v8 }
  0x49   :  { %v219_v47 = vadd.f32 %v215_v27, %v195_v40  ;;  %v144_v49 = vadd.f32 %v136_v36, %v119_v39  ;;  %v290_v12 = vadd.f32 %v286_v20, %v266_v43  ;;  %v287_v52 = vmul.f32 %v280_v31, %v98_v55 }
  0x4a   :  { %v192_v53 = vmul.f32 %v188_v44, %v99_v28  ;;  %v216_v46 = vmul.f32 %v212_v45, %v148_v37  ;;  %v260_v57 = vrot.slane %v94_v19, %v771_v4  ;;  %v311_v48 = vmul.f32 %v304_v38, %v147_v60 }
  0x4b   :  { %v243_v54 = vadd.f32 %v239_v30, %v219_v47  ;;  %v172_v56 = vadd.f32 %v168_v50, %v144_v49  ;;  %v314_v58 = vadd.f32 %v310_v26, %v290_v12  ;;  %v240_v62 = vmul.f32 %v236_v51, %v99_v28  ;;  %v410_v26 = vld [vmem:[%s904_s5] sm:$0x3] }
  0x4c   :  { %v284_v3 = vrot.slane %v94_v19, %v783_v10  ;;  %v264_v1 = vmul.f32 %v260_v57, %v148_v37  ;;  %v308_v11 = vrot.slane %v94_v19, %v773_v5  ;;  %564 = vtanh.f32 %v313_v42  ;;  %v439_v30 = vld [vmem:[%s906_s7] sm:$0x3] }
  0x4d   :  { %v267_v59 = vadd.f32 %v263_v33, %v243_v54  ;;  %v196_v61 = vadd.f32 %v192_v53, %v172_v56  ;;  %v427_v29 = vrot.slane %v410_v26, %v767_v2  ;;  %v456_v31 = vrot.slane %v439_v30, %v767_v2  ;;  %v547_v57 = vld [vmem:[%s905_s6] ss:$0 sm:$0xff] }
  0x4e   :  { %v288_v14 = vmul.f32 %v284_v3, %v99_v28  ;;  %v312_v16 = vmul.f32 %v308_v11, %v148_v37  ;;  %v326_v32 = vrot.slane %v781_v9, %v775_v6  ;;  %v352_v33 = vrot.slane %v781_v9, %v777_v7 }
  0x4f   :  { %v291_v63 = vadd.f32 %v287_v52, %v267_v59  ;;  %v220_v0 = vadd.f32 %v216_v46, %v196_v61  ;;  %v372_v40 = vrot.slane %v781_v9, %v779_v8  ;;  %v392_v43 = vrot.slane %v781_v9, %v783_v10  ;;  %v468_v9 = vld [vmem:[%s908_s9] sm:$0x3] }
  0x50   :  { %v415_v53 = vrot.slane %v410_v26, %v775_v6  ;;  %v485_v10 = vrot.slane %v468_v9, %v767_v2  ;;  %v444_v61 = vrot.slane %v439_v30, %v775_v6  ;;  %v550_v26 = vld [vmem:[%s911_s12] ss:$0 sm:$0xff] }
  0x51   :  { %v315_v13 = vadd.f32 %v311_v48, %v291_v63  ;;  %v244_v55 = vadd.f32 %v240_v62, %v220_v0 }
  0x53   :  { %v268_v15 = vadd.f32 %v264_v1, %v244_v55  ;;  %566 = vtanh.f32 %v315_v13  ;;  %v497_v1 = vld [vmem:[%s910_s11] sm:$0x3] }
  0x54   :  { %568 = vtanh.f32 %v314_v58  ;;  %v514_v11 = vrot.slane %v497_v1, %v767_v2  ;;  %v548_v13 = vld [vmem:[%s907_s8] ss:$0 sm:$0xff]  ;;  %s684_s8 = smov 124  }
  0x55   :  { %v292_v17 = vadd.f32 %v288_v14, %v268_v15  ;;  %v549_v2 = vld [vmem:[%s909_s10] ss:$0 sm:$0xff] }
  0x57   :  { %v316_v18 = vadd.f32 %v312_v16, %v292_v17  ;;  %v473_v16 = vrot.slane %v468_v9, %v775_v6 }
  0x59   :  { %570 = vtanh.f32 %v316_v18  ;;  %v565_v4 = vpop.eup %564 }
  0x5a   :  { %v327_v34 = vmul.f32 %v565_v4, %v326_v32 }
  0x5c   :  { %v334_v36 = vadd.f32 %v546_v35, %v327_v34 }
  0x60   :  { %v567_v60 = vpop.eup %566 }
  0x61   :  { %v569_v23 = vpop.eup %568  ;;  %v373_v42 = vmul.f32 %v567_v60, %v372_v40 }
  0x62   :  { %v353_v37 = vmul.f32 %v569_v23, %v352_v33 }
  0x66   :  { %v571_v19 = vpop.eup %570 }
  0x67   :  { %v393_v50 = vmul.f32 %v571_v19, %v392_v43 }
  0xa9   :  { %v341_v20 = vpop.permute.xlu0 %340  ;;  %v381_v21 = vpop.permute.xlu1 %380 }
  0xaa   :  { %v343_v22 = vmul.f32 %v565_v4, %v341_v20  ;;  %v383_v5 = vmul.f32 %v567_v60, %v381_v21 }
  0xac   :  { %345 = vrot.lane.b32.xlu0 %v343_v22, %s676_s2 }
  0xad   :  { %v361_v24 = vpop.permute.xlu0 %360  ;;  %v401_v25 = vpop.permute.xlu1 %400 }
  0xae   :  { %v363_v27 = vmul.f32 %v569_v23, %v361_v24  ;;  %v403_v28 = vmul.f32 %v571_v19, %v401_v25  ;;  %v502_v23 = vrot.slane %v497_v1, %v775_v6 }
  0xb0   :  { %365 = vrot.lane.b32.xlu1 %v363_v27, %s676_s2  ;;  %385 = vrot.lane.b32.xlu0 %v383_v5, %s676_s2 }
  0xb4   :  { %405 = vrot.lane.b32.xlu1 %v403_v28, %s676_s2  ;;  %429 = vrot.lane.b32.xlu0 %v427_v29, %s677_s27 }
  0xb8   :  { %458 = vrot.lane.b32.xlu0 %v456_v31, %s678_s30 }
  0xbc   :  { %487 = vrot.lane.b32.xlu0 %v485_v10, %s680_s16 }
  0xc0   :  { %516 = vrot.lane.b32.xlu0 %v514_v11, %s682_s21 }
 0x11e   :  { %v346_v38 = vpop.permute.xlu0 %345 }
 0x11f   :  { %v348_v39 = vadd.f32 %v346_v38, %v334_v36 }
 0x121   :  { %v354_v41 = vadd.f32 %v353_v37, %v348_v39 }
 0x122   :  { %v366_v44 = vpop.permute.xlu1 %365  ;;  %v386_v47 = vpop.permute.xlu0 %385 }
 0x123   :  { %v368_v45 = vadd.f32 %v366_v44, %v354_v41 }
 0x125   :  { %v374_v49 = vadd.f32 %v373_v42, %v368_v45 }
 0x126   :  { %v406_v12 = vpop.permute.xlu1 %405  ;;  %v430_v8 = vpop.permute.xlu0 %429 }
 0x127   :  { %v388_v51 = vadd.f32 %v386_v47, %v374_v49 }
 0x129   :  { %v394_v7 = vadd.f32 %v393_v50, %v388_v51 }
 0x12a   :  { %v459_v62 = vpop.permute.xlu0 %458 }
 0x12b   :  { %v408_v52 = vadd.f32 %v406_v12, %v394_v7 }
 0x12d   :  { %572 = vtanh.f32 %v408_v52 }
 0x12e   :  { %v488_v17 = vpop.permute.xlu0 %487 }
 0x132   :  { %v517_v5 = vpop.permute.xlu0 %516 }
 0x13a   :  { %v573_v54 = vpop.eup %572 }
 0x13b   :  { %v432_v56 = vmul.f32 %v573_v54, %v430_v8  ;;  %v416_v46 = vmul.f32 %v573_v54, %v415_v53 }
 0x13d   :  { %434 = vrot.lane.b32.xlu1 %v432_v56, %s679_s4  ;;  %v423_v58 = vadd.f32 %v547_v57, %v416_v46 }
 0x1af   :  { %v435_v48 = vpop.permute.xlu1 %434 }
 0x1b0   :  { %v437_v59 = vadd.f32 %v435_v48, %v423_v58 }
 0x1b2   :  { %574 = vtanh.f32 %v437_v59 }
 0x1bf   :  { %v575_v3 = vpop.eup %574 }
 0x1c0   :  { %v461_v63 = vmul.f32 %v575_v3, %v459_v62  ;;  %v445_v0 = vmul.f32 %v575_v3, %v444_v61 }
 0x1c2   :  { %463 = vrot.lane.b32.xlu1 %v461_v63, %s681_s19  ;;  %v452_v55 = vadd.f32 %v548_v13, %v445_v0 }
 0x234   :  { %v464_v14 = vpop.permute.xlu1 %463 }
 0x235   :  { %v466_v15 = vadd.f32 %v464_v14, %v452_v55 }
 0x237   :  { %576 = vtanh.f32 %v466_v15 }
 0x244   :  { %v577_v18 = vpop.eup %576 }
 0x245   :  { %v490_v4 = vmul.f32 %v577_v18, %v488_v17  ;;  %v474_v60 = vmul.f32 %v577_v18, %v473_v16 }
 0x247   :  { %492 = vrot.lane.b32.xlu1 %v490_v4, %s683_s1  ;;  %v481_v20 = vadd.f32 %v549_v2, %v474_v60 }
 0x2b9   :  { %v493_v21 = vpop.permute.xlu1 %492 }
 0x2ba   :  { %v495_v22 = vadd.f32 %v493_v21, %v481_v20 }
 0x2bc   :  { %578 = vtanh.f32 %v495_v22 }
 0x2c9   :  { %v579_v19 = vpop.eup %578 }
 0x2ca   :  { %v519_v24 = vmul.f32 %v579_v19, %v517_v5  ;;  %v503_v25 = vmul.f32 %v579_v19, %v502_v23 }
 0x2cc   :  { %521 = vrot.lane.b32.xlu1 %v519_v24, %s684_s8  ;;  %v510_v27 = vadd.f32 %v550_v26, %v503_v25 }
 0x33e   :  { %v522_v28 = vpop.permute.xlu1 %521 }
 0x33f   :  { %v524_v29 = vadd.f32 %v522_v28, %v510_v27 }
 0x341   :  { %580 = vtanh.f32 %v524_v29 }
 0x34e   :  { %v581_v30 = vpop.eup %580 }
 0x34f   :  { %v527_v31 = vsel %vm526_vm0, %v581_v30, -inf }
 0x350   :  { %528 = vmax.xlane.f32.xlu0 %v527_v31 }
 0x3d9   :  { %v529_v32 = vpop.xlane.xlu0 %528 }
 0x3da   :  { %v530_v6 = vsub.f32 %v581_v30, %v529_v32 }
 0x3dc   :  { %v531_v34 = vmul.f32 1.442695, %v530_v6 }
 0x3de   :  { %582 = vpow2.f32 %v531_v34 }
 0x3eb   :  { %v583_v35 = vpop.eup %582 }
 0x3ec   :  { %v533_v33 = vsel %vm526_vm0, %v583_v35, 0.0 }
 0x3ed   :  { %534 = vadd.xlane.f32.xlu1 %v533_v33 }
 0x476   :  { %v535_v36 = vpop.xlane.xlu1 %534 }
 0x477   :  { %584 = vrcp.f32 %v535_v36 }
 0x484   :  { %v585_v37 = vpop.eup %584 }
 0x485   :  { %v537_v40 = vmul.f32 %v585_v37, %v583_v35 }
 0x487   :  { %538 = vst.msk [vmem:[%s912_s13] sm:$0xff] %vm526_vm0, %v537_v40 }
 0x488   :  { %543 = vsyncpa [#allocation3], 1 }
 0x489   :  { %544 = vsyncpa [#allocation5], 1 }
 0x48a   :  { %545 = vsyncpa [#allocation8], 1 }

</bundles_post_ra>
